<compile_context>
chip_gen: v7x
topology: tpu7x:2x2x1
jax: 0.10.0
libtpu: 0.0.40
codegen_flags: <defaults>
</compile_context>

<pallas_src>
import jax
import jax.numpy as jnp
from jax.experimental import pallas as pl
from jax.experimental.pallas import tpu as pltpu


def _round_up(x: int, m: int) -> int:
    return (x + m - 1) // m * m


def _vmem_budget_bytes() -> int:
    """~78% of this generation's VMEM (v5e/v6e 128 MiB, v7x 64 MiB)."""
    cap = 64 * 1024 * 1024
    try:
        cap = int(getattr(pltpu.get_tpu_info(), "vmem_capacity_bytes", cap))
    except Exception:
        pass
    return int(cap * 0.78)


# --------------------------------------------------------------------------------------
# Kernels
# --------------------------------------------------------------------------------------

def highway_kernel(x_ref, w_ref, b_ref, o_ref):
    """Resident-weight path: one fused MXU pass per row tile.

    w_ref = [Wu^T | Wc^T]  (Hp, 2Hp): columns [0:Hp) -> update, [Hp:2Hp) -> carry gate.
    """
    hp = o_ref.shape[-1]
    x = x_ref[...]
    xw = x if x.dtype == w_ref.dtype else x.astype(w_ref.dtype)   # cast only the MXU input
    y = jnp.dot(xw, w_ref[...], preferred_element_type=jnp.float32) + b_ref[...]
    z = jnp.tanh(y[:, :hp])                       # update      (EUP, f32)
    t = jax.nn.sigmoid(y[:, hp:])                 # carry gate  (EUP, f32)
    xf = x.astype(jnp.float32)                    # residual kept in input precision, f32 epilogue
    o_ref[...] = (xf + t * (z - xf)).astype(o_ref.dtype)          # t*z + (1-t)*x


def highway_kernel_tiled(x_ref, w_ref, b_ref, o_ref, y_scratch):
    """Large-H path: grid axis 1 walks tn-wide column chunks of the fused weight so the
    resident weight block stays bounded (v7x: 64 MiB VMEM).  Pre-activations land in an
    f32 VMEM scratch; the epilogue runs chunk-wise at the last step."""
    n = pl.program_id(1)
    x = x_ref[...]
    xw = x if x.dtype == w_ref.dtype else x.astype(w_ref.dtype)
    y_scratch[n] = jnp.dot(xw, w_ref[...], preferred_element_type=jnp.float32) + b_ref[...]

    @pl.when(n == pl.num_programs(1) - 1)
    def _():
        hp = o_ref.shape[-1]
        tn = y_scratch.shape[-1]
        nz = hp // tn                             # chunks per half (tn divides Hp)
        xf = x.astype(jnp.float32)
        for j in range(nz):                       # static unroll, 128-aligned static slices
            z = jnp.tanh(y_scratch[j])
            t = jax.nn.sigmoid(y_scratch[j + nz])
            xs = xf[:, j * tn:(j + 1) * tn]
            o_ref[:, j * tn:(j + 1) * tn] = (xs + t * (z - xs)).astype(o_ref.dtype)


# --------------------------------------------------------------------------------------
# Wrappers
# --------------------------------------------------------------------------------------

def prepare_highway_params(w_update, b_update, w_carry, b_carry, *,
                           weight_dtype=jnp.bfloat16):
    """One-time glue (keep out of the hot path): transpose PyTorch (out, in) weights to
    (in, out), fuse [update | carry] along the output dim, zero-pad the hidden dim up to
    a multiple of 128 lanes, and cast the weight to `weight_dtype` (default bf16 -> half
    the resident VMEM / weight DMA and native MXU rate; bias stays f32)."""
    H = w_update.shape[0]
    Hp = _round_up(max(H, 128), 128)

    def pad_w(w):
        wt = jnp.transpose(w).astype(weight_dtype)                 # (H_in, H_out)
        return jnp.pad(wt, ((0, Hp - H), (0, Hp - H)))

    def pad_b(b):
        return jnp.pad(b.astype(jnp.float32), (0, Hp - H))

    w_fused = jnp.concatenate([pad_w(w_update), pad_w(w_carry)], axis=1)     # (Hp, 2Hp)
    b_fused = jnp.concatenate([pad_b(b_update), pad_b(b_carry)]).reshape(1, 2 * Hp)
    return w_fused, b_fused, H, Hp


def highway_block_fused(x, w_fused, b_fused, hidden_size, *, tm=None, tn=None,
                        force_tiled=False):
    """x: (..., H) in its native dtype. w_fused: (Hp, 2Hp) pre-transposed/padded/cast,
    b_fused: (1, 2Hp) f32. Output dtype matches x.dtype."""
    Hp = w_fused.shape[0]
    orig_shape = x.shape
    H = orig_shape[-1]
    assert H == hidden_size and w_fused.shape == (Hp, 2 * Hp)

    x2d = x.reshape(-1, H)                        # no wrapper-side dtype cast
    if Hp != H:                                   # lane-pad only when H % 128 != 0
        x2d = jnp.pad(x2d, ((0, 0), (0, Hp - H)))
    M = x2d.shape[0]
    out_dtype = x.dtype

    x_isz = jnp.dtype(x.dtype).itemsize
    w_isz = jnp.dtype(w_fused.dtype).itemsize
    o_isz = jnp.dtype(out_dtype).itemsize
    w_bytes = 2 * Hp * Hp * w_isz
    vmem_budget = _vmem_budget_bytes()

    # Row tile: big enough that each X/out DMA is >= ~1 MiB (per-step overhead ~0.35us),
    # capped once the fused weight gets wide.
    if tm is None:
        tm = 1024 if Hp <= 256 else (512 if Hp <= 512 else 256)
    tm_eff = min(tm, _round_up(M, 8))
    # v7x has 2 TensorCores: give the "parallel" M axis >=2 steps when there is enough
    # work to split (one extra ~0.35us step is noise on single-TC v5e/v6e).
    while pl.cdiv(M, tm_eff) < 2 and tm_eff >= 512:
        tm_eff //= 2
    num_m_tiles = pl.cdiv(M, tm_eff)

    # Path selection: keep the fused weight resident unless it (worst-case double
    # buffered) plus streaming tiles would blow this generation's VMEM budget.
    y_bytes = tm_eff * 2 * Hp * 4
    tile_bytes = 2 * tm_eff * Hp * (x_isz + o_isz) + y_bytes
    use_tiled = force_tiled or (2 * w_bytes + tile_bytes + (4 << 20) > vmem_budget)

    flops = 4 * M * Hp * Hp                       # 2 * M * Hp * (2*Hp)
    transcendentals = 2 * M * Hp                  # tanh + sigmoid

    if not use_tiled:
        cost = pl.CostEstimate(
            flops=int(flops), transcendentals=int(transcendentals),
            bytes_accessed=int(M * Hp * x_isz + w_bytes + b_fused.size * 4 + M * Hp * o_isz))

        def run(single_buffer_weight: bool):
            if single_buffer_weight:
                # Constant-index weight/bias: double-buffering them is pure VMEM waste.
                w_spec = pl.BlockSpec((Hp, 2 * Hp), lambda i: (0, 0),
                                      pipeline_mode=pl.Buffered(1))
                b_spec = pl.BlockSpec((1, 2 * Hp), lambda i: (0, 0),
                                      pipeline_mode=pl.Buffered(1))
            else:
                w_spec = pl.BlockSpec((Hp, 2 * Hp), lambda i: (0, 0))
                b_spec = pl.BlockSpec((1, 2 * Hp), lambda i: (0, 0))
            return pl.pallas_call(
                highway_kernel,
                out_shape=jax.ShapeDtypeStruct((M, Hp), out_dtype),
                grid_spec=pltpu.PrefetchScalarGridSpec(
                    num_scalar_prefetch=0,
                    grid=(num_m_tiles,),
                    in_specs=[
                        pl.BlockSpec((tm_eff, Hp), lambda i: (i, 0)),   # X rows (streamed)
                        w_spec,                                         # fused weight (resident)
                        b_spec,                                         # fused bias   (resident)
                    ],
                    out_specs=pl.BlockSpec((tm_eff, Hp), lambda i: (i, 0)),
                ),
                compiler_params=pltpu.CompilerParams(
                    dimension_semantics=("parallel",),
                    vmem_limit_bytes=vmem_budget,
                ),
                cost_estimate=cost,
            )(x2d, w_fused, b_fused)

        try:
            out = run(single_buffer_weight=True)
        except Exception:   # older JAX without BlockSpec pipeline_mode / Buffered(1)
            out = run(single_buffer_weight=False)
    else:
        # Column-chunked fused weight (large H / v7x): tn | Hp and tn % 128 == 0.
        if tn is None:
            target = max(128, (4 * 1024 * 1024) // max(1, Hp * w_isz))
            tn = 128
            while tn * 2 <= target and tn * 2 <= Hp and Hp % (tn * 2) == 0:
                tn *= 2
        assert tn % 128 == 0 and Hp % tn == 0
        num_n_tiles = (2 * Hp) // tn

        cost = pl.CostEstimate(
            flops=int(flops), transcendentals=int(transcendentals),
            bytes_accessed=int(M * Hp * x_isz + w_bytes * num_m_tiles
                               + b_fused.size * 4 + M * Hp * o_isz))

        out = pl.pallas_call(
            highway_kernel_tiled,
            out_shape=jax.ShapeDtypeStruct((M, Hp), out_dtype),
            grid_spec=pltpu.PrefetchScalarGridSpec(
                num_scalar_prefetch=0,
                grid=(num_m_tiles, num_n_tiles),
                in_specs=[
                    pl.BlockSpec((tm_eff, Hp), lambda i, n: (i, 0)),    # X rows (resident over n)
                    pl.BlockSpec((Hp, tn), lambda i, n: (0, n)),        # weight column chunk
                    pl.BlockSpec((1, tn), lambda i, n: (0, n)),         # bias chunk
                ],
                out_specs=pl.BlockSpec((tm_eff, Hp), lambda i, n: (i, 0)),
                scratch_shapes=[pltpu.VMEM((num_n_tiles, tm_eff, tn), jnp.float32)],
            ),
            compiler_params=pltpu.CompilerParams(
                dimension_semantics=("parallel", "arbitrary"),
                vmem_limit_bytes=vmem_budget,
            ),
            cost_estimate=cost,
        )(x2d, w_fused, b_fused)

    if Hp != H:
        out = out[:, :H]
    return out.reshape(orig_shape)


def highway_block(x, w_update, b_update, w_carry, b_carry, *,
                  weight_dtype=jnp.bfloat16, tm=None, tn=None, force_tiled=False):
    """Convenience wrapper taking PyTorch nn.Linear-layout params. In real use call
    prepare_highway_params() once and reuse the fused weights across calls."""
    w_fused, b_fused, H, _ = prepare_highway_params(
        w_update, b_update, w_carry, b_carry, weight_dtype=weight_dtype)
    return highway_block_fused(x, w_fused, b_fused, H, tm=tm, tn=tn, force_tiled=force_tiled)


def highway_ref(x, w_update, b_update, w_carry, b_carry):
    """Pure-JAX reference matching the PyTorch forward (eval mode)."""
    t = jax.nn.sigmoid(x @ w_carry.T + b_carry)
    z = jnp.tanh(x @ w_update.T + b_update)
    return t * z + (1.0 - t) * x


if __name__ == "__main__":
    root = jax.random.PRNGKey(0)

    def make_params(key, H):
        k_wu, k_bu, k_wc, k_bc = jax.random.split(key, 4)
        bound = 1.0 / (H ** 0.5)   # mimic nn.Linear's uniform(-1/sqrt(H), 1/sqrt(H))
        return (jax.random.uniform(k_wu, (H, H), jnp.float32, -bound, bound),
                jax.random.uniform(k_bu, (H,), jnp.float32, -bound, bound),
                jax.random.uniform(k_wc, (H, H), jnp.float32, -bound, bound),
                jax.random.uniform(k_bc, (H,), jnp.float32, -bound, bound))

    # TODO(synk): DropConnect training-mode Bernoulli weight masking is not implemented;
    # eval/inference semantics (identity mask) are reproduced exactly.

    k_x1, k_p1, k_x2, k_p2 = jax.random.split(root, 4)

    # Case 1: H=32 (lane-padded to 128), f32 weights -> tight tolerance.
    x1 = jax.random.normal(k_x1, (2, 8, 32), jnp.float32)
    p1 = make_params(k_p1, 32)
    ref1 = highway_ref(x1, *p1)
    out1 = jax.block_until_ready(highway_block(x1, *p1, weight_dtype=jnp.float32))
    assert out1.shape == x1.shape
    assert jnp.allclose(out1, ref1, atol=5e-5, rtol=5e-5), "f32 path mismatch"

    # Case 2: default bf16 weight storage (f32 accumulation) -> bf16-level tolerance.
    out1b = jax.block_until_ready(highway_block(x1, *p1))
    assert jnp.allclose(out1b, ref1, atol=5e-2, rtol=5e-2), "bf16-weight path mismatch"

    # Case 3: H=128 (no lane padding), ragged M=21 (no wrapper-side row padding).
    x2 = jax.random.normal(k_x2, (3, 7, 128), jnp.float32)
    p2 = make_params(k_p2, 128)
    ref2 = highway_ref(x2, *p2)
    out2 = jax.block_until_ready(highway_block(x2, *p2, weight_dtype=jnp.float32))
    assert jnp.allclose(out2, ref2, atol=5e-5, rtol=5e-5), "ragged-M path mismatch"

    # Case 4: force the column-chunked large-H path at small size to validate it.
    wf, bf, Hh, _ = prepare_highway_params(*p2, weight_dtype=jnp.float32)
    out3 = jax.block_until_ready(
        highway_block_fused(x2, wf, bf, Hh, force_tiled=True, tn=128))
    assert jnp.allclose(out3, ref2, atol=5e-5, rtol=5e-5), "tiled (large-H) path mismatch"

    print("KERNEL_OK")
</pallas_src>

<mosaic_0001>
module attributes {stable_mosaic.version = 11 : i64} {
  func.func @highway_kernel(%arg0: i32, %arg1: memref<16x128xf32, #tpu.memory_space<vmem>>, %arg2: memref<128x256xf32, #tpu.memory_space<vmem>>, %arg3: memref<1x256xf32, #tpu.memory_space<vmem>>, %arg4: memref<16x128xf32, #tpu.memory_space<vmem>>) attributes {dimension_semantics = [#tpu.dimension_semantics<parallel>], iteration_bounds = array<i64: 1>, scalar_prefetch = 0 : i64, scratch_operands = 0 : i64, tpu.core_type = #tpu.core_type<tc>, window_params = [{transform_indices = @transform_0, window_bounds = array<i64: 16, 128>}, {pipeline_mode = #tpu.pipeline_mode<synchronous>, transform_indices = @transform_1, window_bounds = array<i64: 128, 256>}, {pipeline_mode = #tpu.pipeline_mode<synchronous>, transform_indices = @transform_2, window_bounds = array<i64: 1, 256>}, {transform_indices = @transform_3, window_bounds = array<i64: 16, 128>}]} {
    %c0 = arith.constant 0 : index
    %c0_0 = arith.constant 0 : index
    %0 = vector.load %arg1[%c0, %c0_0] : memref<16x128xf32, #tpu.memory_space<vmem>>, vector<16x128xf32>
    %c0_1 = arith.constant 0 : index
    %c0_2 = arith.constant 0 : index
    %1 = vector.load %arg2[%c0_1, %c0_2] : memref<128x256xf32, #tpu.memory_space<vmem>>, vector<128x256xf32>
    %cst = arith.constant dense<0.000000e+00> : vector<16x256xf32>
    %2 = tpu.matmul %0, %1, %cst {dimension_numbers = #tpu.dot_dimension_numbers<[1], [0], [0], [1], [0, 0, 1, 1], [], []>} : vector<16x128xf32>, vector<128x256xf32>, vector<16x256xf32> -> vector<16x256xf32>
    %c0_3 = arith.constant 0 : index
    %c0_4 = arith.constant 0 : index
    %3 = vector.load %arg3[%c0_3, %c0_4] : memref<1x256xf32, #tpu.memory_space<vmem>>, vector<1x256xf32>
    %4 = vector.broadcast %3 : vector<1x256xf32> to vector<16x256xf32>
    %5 = arith.addf %2, %4 : vector<16x256xf32>
    %6 = vector.extract_strided_slice %5 {offsets = [0, 0], sizes = [16, 128], strides = [1, 1]} : vector<16x256xf32> to vector<16x128xf32>
    %7 = math.tanh %6 : vector<16x128xf32>
    %8 = vector.extract_strided_slice %5 {offsets = [0, 128], sizes = [16, 128], strides = [1, 1]} : vector<16x256xf32> to vector<16x128xf32>
    %9 = arith.negf %8 : vector<16x128xf32>
    %10 = math.exp %9 : vector<16x128xf32>
    %cst_5 = arith.constant 1.000000e+00 : f32
    %11 = vector.broadcast %cst_5 : f32 to vector<16x128xf32>
    %12 = arith.addf %11, %10 : vector<16x128xf32>
    %13 = arith.divf %11, %12 : vector<16x128xf32>
    %14 = arith.subf %7, %0 : vector<16x128xf32>
    %15 = arith.mulf %13, %14 : vector<16x128xf32>
    %16 = arith.addf %0, %15 : vector<16x128xf32>
    %c0_6 = arith.constant 0 : index
    %c0_7 = arith.constant 0 : index
    %17 = vector.load %arg4[%c0_6, %c0_7] : memref<16x128xf32, #tpu.memory_space<vmem>>, vector<16x128xf32>
    tpu.vector_store %arg4[%c0_6, %c0_7], %16 {strides = array<i32>} : memref<16x128xf32, #tpu.memory_space<vmem>>, vector<16x128xf32>,
    return
  }
  func.func @transform_0(%arg0: i32) -> (i32, i32) {
    %c0_i32 = arith.constant 0 : i32
    %c0_i32_0 = arith.constant 0 : i32
    return %arg0, %c0_i32 : i32, i32
  }
  func.func @transform_1(%arg0: i32) -> (i32, i32) {
    %c0_i32 = arith.constant 0 : i32
    %c0_i32_0 = arith.constant 0 : i32
    %c0_i32_1 = arith.constant 0 : i32
    return %c0_i32, %c0_i32_0 : i32, i32
  }
  func.func @transform_2(%arg0: i32) -> (i32, i32) {
    %c0_i32 = arith.constant 0 : i32
    %c0_i32_0 = arith.constant 0 : i32
    %c0_i32_1 = arith.constant 0 : i32
    return %c0_i32, %c0_i32_0 : i32, i32
  }
  func.func @transform_3(%arg0: i32) -> (i32, i32) {
    %c0_i32 = arith.constant 0 : i32
    %c0_i32_0 = arith.constant 0 : i32
    return %arg0, %c0_i32 : i32, i32
  }
}

module attributes {stable_mosaic.version = 11 : i64} {
  func.func @highway_kernel(%arg0: i32, %arg1: memref<16x128xf32, #tpu.memory_space<vmem>>, %arg2: memref<128x256xf32, #tpu.memory_space<vmem>>, %arg3: memref<1x256xf32, #tpu.memory_space<vmem>>, %arg4: memref<16x128xf32, #tpu.memory_space<vmem>>) attributes {dimension_semantics = [#tpu.dimension_semantics<parallel>], iteration_bounds = array<i64: 1>, scalar_prefetch = 0 : i64, scratch_operands = 0 : i64, tpu.core_type = #tpu.core_type<tc>, window_params = [{transform_indices = @transform_0, window_bounds = array<i64: 16, 128>}, {pipeline_mode = #tpu.pipeline_mode<synchronous>, transform_indices = @transform_1, window_bounds = array<i64: 128, 256>}, {pipeline_mode = #tpu.pipeline_mode<synchronous>, transform_indices = @transform_2, window_bounds = array<i64: 1, 256>}, {transform_indices = @transform_3, window_bounds = array<i64: 16, 128>}]} {
    %c0 = arith.constant 0 : index
    %c0_0 = arith.constant 0 : index
    %0 = vector.load %arg1[%c0, %c0_0] : memref<16x128xf32, #tpu.memory_space<vmem>>, vector<16x128xf32>
    %c0_1 = arith.constant 0 : index
    %c0_2 = arith.constant 0 : index
    %1 = vector.load %arg2[%c0_1, %c0_2] : memref<128x256xf32, #tpu.memory_space<vmem>>, vector<128x256xf32>
    %cst = arith.constant dense<0.000000e+00> : vector<16x256xf32>
    %2 = tpu.matmul %0, %1, %cst {dimension_numbers = #tpu.dot_dimension_numbers<[1], [0], [0], [1], [0, 0, 1, 1], [], []>} : vector<16x128xf32>, vector<128x256xf32>, vector<16x256xf32> -> vector<16x256xf32>
    %c0_3 = arith.constant 0 : index
    %c0_4 = arith.constant 0 : index
    %3 = vector.load %arg3[%c0_3, %c0_4] : memref<1x256xf32, #tpu.memory_space<vmem>>, vector<1x256xf32>
    %4 = vector.broadcast %3 : vector<1x256xf32> to vector<16x256xf32>
    %5 = arith.addf %2, %4 : vector<16x256xf32>
    %6 = vector.extract_strided_slice %5 {offsets = [0, 0], sizes = [16, 128], strides = [1, 1]} : vector<16x256xf32> to vector<16x128xf32>
    %7 = math.tanh %6 : vector<16x128xf32>
    %8 = vector.extract_strided_slice %5 {offsets = [0, 128], sizes = [16, 128], strides = [1, 1]} : vector<16x256xf32> to vector<16x128xf32>
    %9 = arith.negf %8 : vector<16x128xf32>
    %10 = math.exp %9 : vector<16x128xf32>
    %cst_5 = arith.constant 1.000000e+00 : f32
    %11 = vector.broadcast %cst_5 : f32 to vector<16x128xf32>
    %12 = arith.addf %11, %10 : vector<16x128xf32>
    %13 = arith.divf %11, %12 : vector<16x128xf32>
    %14 = arith.subf %7, %0 : vector<16x128xf32>
    %15 = arith.mulf %13, %14 : vector<16x128xf32>
    %16 = arith.addf %0, %15 : vector<16x128xf32>
    %c0_6 = arith.constant 0 : index
    %c0_7 = arith.constant 0 : index
    %17 = vector.load %arg4[%c0_6, %c0_7] : memref<16x128xf32, #tpu.memory_space<vmem>>, vector<16x128xf32>
    tpu.vector_store %arg4[%c0_6, %c0_7], %16 {strides = array<i32>} : memref<16x128xf32, #tpu.memory_space<vmem>>, vector<16x128xf32>,
    return
  }
  func.func @transform_0(%arg0: i32) -> (i32, i32) {
    %c0_i32 = arith.constant 0 : i32
    %c0_i32_0 = arith.constant 0 : i32
    return %arg0, %c0_i32 : i32, i32
  }
  func.func @transform_1(%arg0: i32) -> (i32, i32) {
    %c0_i32 = arith.constant 0 : i32
    %c0_i32_0 = arith.constant 0 : i32
    %c0_i32_1 = arith.constant 0 : i32
    return %c0_i32, %c0_i32_0 : i32, i32
  }
  func.func @transform_2(%arg0: i32) -> (i32, i32) {
    %c0_i32 = arith.constant 0 : i32
    %c0_i32_0 = arith.constant 0 : i32
    %c0_i32_1 = arith.constant 0 : i32
    return %c0_i32, %c0_i32_0 : i32, i32
  }
  func.func @transform_3(%arg0: i32) -> (i32, i32) {
    %c0_i32 = arith.constant 0 : i32
    %c0_i32_0 = arith.constant 0 : i32
    return %arg0, %c0_i32 : i32, i32
  }
}

</mosaic_0001>

<bundles_post_ra>
// kernel: tpu_custom_call.1
= control target key start
LH: loop header
LB: loop body
LE: loop exit
PB: predicated region body
PF: predicated region fallthrough
CT: control target
= control target key end

     0   :  { %8 = vsyncpa [#allocation3], 0  ;;  %s421_s0 = inlined_call_operand.hbm [shape: f32[16,128], index: 0, kind: input, shape index: {}]   ;;  %s422_s1 = inlined_call_operand.hbm [shape: f32[128,256], index: 1, kind: input, shape index: {}]   ;;  %s423_s2 = inlined_call_operand.vmem [shape: f32[1,256], index: 2, kind: input, shape index: {}]   ;;  %s424_s3 = inlined_call_operand.hbm [shape: f32[16,128], index: 3, kind: output, shape index: {}]  }
   0x1   :  { %9 = vsyncpa [#allocation6], 0 }
   0x2   :  { %10 = vsyncpa [#allocation4], 0  ;;  %s348_s12 = smov [#allocation2]   ;;  %s276_s16 = scalar_lea.hbm %s421_s0, 256 }
   0x3   :  { %s16_s13 = sshll.u32 %s348_s12, 4  ;;  %p277_p0 = scmp.ne.s32.totalorder %s421_s0, %s276_s16  ;;  %s17_s13 = int_to_ptr.vmem [resolvable:$true] %s16_s13 }
   0x4   :  { %p280_p1 = scmp.lt.u32.totalorder %s276_s16, %s421_s0 }
   0x6   :  { %p282_p2 = pnand %p280_p1, %p277_p0 }
   0x8   :  { %285 = shalt.err (!%p282_p2)
}
   0x9   :  { %s286_s21 = scalar_lea.vmem %s17_s13, 256  ;;  %p291_p4 = scmp.lt.s32.totalorder %s17_s13, %s17_s13 }
   0xa   :  { %p287_p3 = scmp.ne.s32.totalorder %s17_s13, %s286_s21  ;;  %p292_p5 = scmp.lt.s32.totalorder %s286_s21, %s286_s21 }
   0xc   :  { %p293_p6 = por %p292_p5, %p291_p4 }
   0xe   :  { %p294_p7 = pnand %p293_p6, %p287_p3 }
  0x10   :  { %297 = shalt.err (!%p294_p7)
}
  0x11   :  { %s349_s22 = smov 128   ;;  %s350_s23 = smov 8  }
  0x12   :  { %22 = dma.hbm_to_vmem [thread:$0]  %s421_s0, 256, %s17_s13, [#allocation3], %s349_s22, %s349_s22, %s350_s23  }
  0x13   :  { %s351_s26 = smov [#allocation5]   ;;  %s298_s30 = scalar_lea.hbm %s422_s1, 4096 }
  0x14   :  { %s28_s27 = sshll.u32 %s351_s26, 4  ;;  %p299_p8 = scmp.ne.s32.totalorder %s422_s1, %s298_s30  ;;  %s29_s27 = int_to_ptr.vmem [resolvable:$true] %s28_s27 }
  0x15   :  { %p302_p9 = scmp.lt.u32.totalorder %s298_s30, %s422_s1 }
  0x17   :  { %p304_p10 = pnand %p302_p9, %p299_p8 }
  0x19   :  { %307 = shalt.err (!%p304_p10)
}
  0x1a   :  { %s308_s8 = scalar_lea.vmem %s29_s27, 4096  ;;  %p313_p12 = scmp.lt.s32.totalorder %s29_s27, %s29_s27 }
  0x1b   :  { %p309_p11 = scmp.ne.s32.totalorder %s29_s27, %s308_s8  ;;  %p314_p13 = scmp.lt.s32.totalorder %s308_s8, %s308_s8 }
  0x1d   :  { %p315_p0 = por %p314_p13, %p313_p12 }
  0x1f   :  { %p316_p1 = pnand %p315_p0, %p309_p11 }
  0x21   :  { %319 = shalt.err (!%p316_p1)
}
  0x22   :  { %s352_s0 = smov 256   ;;  %s353_s9 = smov 16  }
  0x23   :  { %34 = dma.hbm_to_vmem [thread:$0]  %s422_s1, 4096, %s29_s27, [#allocation6], %s352_s0, %s352_s0, %s353_s9  }
  0x24   :  { %342 = dma.done.wait [#allocation3], 256  }
  0x25   :  { %343 = vsyncadd [#allocation3], 4294967040 }
  0x26   :  { %344 = dma.done.wait [#allocation6], 4096  }
  0x27   :  { %345 = vsyncadd [#allocation6], 4294963200  ;;  %v354_v0 = vmov 0.0   ;;  %v46_v1 = vld [vmem:[#allocation5 + $0x8] sm:$0xff]  ;;  %v48_v2 = vld [vmem:[#allocation5 + $0x18] sm:$0xff]  ;;  %v79_v51 = vlaneseq }
  0x28   :  { %153 = vmatprep.mubr.f32.mxu0 %v354_v0  ;;  %159 = vmatprep.mubr.f32.mxu1 %v354_v0  ;;  %v45_v3 = vld [vmem:[#allocation5] sm:$0xff]  ;;  %v208_v4 = vpack.c.bf16 %v48_v2, %v46_v1  ;;  %v47_v5 = vld [vmem:[#allocation5 + $0x10] sm:$0xff]  ;;  %v50_v6 = vld [vmem:[#allocation5 + $0x28] sm:$0xff] }
  0x29   :  { %v52_v7 = vld [vmem:[#allocation5 + $0x38] sm:$0xff]  ;;  %v210_v8 = vpack.c.bf16 %v47_v5, %v45_v3  ;;  %v49_v10 = vld [vmem:[#allocation5 + $0x20] sm:$0xff]  ;;  %v51_v11 = vld [vmem:[#allocation5 + $0x30] sm:$0xff]  ;;  %v80_v52 = vshrl.u32 %v79_v51, 7 }
  0x2a   :  { %v212_v9 = vpack.c.bf16 %v52_v7, %v50_v6  ;;  %v54_v12 = vld [vmem:[#allocation5 + $0x48] sm:$0xff]  ;;  %209 = vmatprep.subr.bf16.mxu0 %v208_v4  ;;  %240 = vmatprep.subr.bf16.mxu1 %v208_v4  ;;  %v56_v13 = vld [vmem:[#allocation5 + $0x58] sm:$0xff]  ;;  %v214_v14 = vpack.c.bf16 %v51_v11, %v49_v10  ;;  %v53_v16 = vld [vmem:[#allocation5 + $0x40] sm:$0xff] }
  0x2b   :  { %211 = vmatpush1.bf16.msra.mxu0 %v210_v8  ;;  %248 = vmatpush1.bf16.msra.mxu1 %v210_v8  ;;  %v216_v15 = vpack.c.bf16 %v56_v13, %v54_v12  ;;  %v55_v17 = vld [vmem:[#allocation5 + $0x50] sm:$0xff]  ;;  %v58_v18 = vld [vmem:[#allocation5 + $0x68] sm:$0xff]  ;;  %v60_v19 = vld [vmem:[#allocation5 + $0x78] sm:$0xff]  ;;  %v85_v53 = vsub.s32 1, %v80_v52  ;;  %v81_v62 = vsub.s32 0, %v80_v52 }
  0x2c   :  { %213 = vmatprep.subr.bf16.mxu0 %v212_v9  ;;  %241 = vmatprep.subr.bf16.mxu1 %v212_v9  ;;  %v218_v20 = vpack.c.bf16 %v55_v17, %v53_v16  ;;  %v220_v21 = vpack.c.bf16 %v60_v19, %v58_v18  ;;  %v57_v22 = vld [vmem:[#allocation5 + $0x60] sm:$0xff]  ;;  %v59_v23 = vld [vmem:[#allocation5 + $0x70] sm:$0xff]  ;;  %v62_v24 = vld [vmem:[#allocation5 + $0x88] sm:$0xff] }
  0x2d   :  { %v64_v25 = vld [vmem:[#allocation5 + $0x98] sm:$0xff]  ;;  %v222_v26 = vpack.c.bf16 %v59_v23, %v57_v22  ;;  %v61_v28 = vld [vmem:[#allocation5 + $0x80] sm:$0xff]  ;;  %v63_v29 = vld [vmem:[#allocation5 + $0x90] sm:$0xff] }
  0x2e   :  { %v224_v27 = vpack.c.bf16 %v64_v25, %v62_v24  ;;  %v66_v30 = vld [vmem:[#allocation5 + $0xa8] sm:$0xff]  ;;  %v68_v31 = vld [vmem:[#allocation5 + $0xb8] sm:$0xff]  ;;  %v226_v32 = vpack.c.bf16 %v63_v29, %v61_v28  ;;  %v65_v34 = vld [vmem:[#allocation5 + $0xa0] sm:$0xff] }
  0x2f   :  { %215 = vmatpush1.bf16.msra.mxu0 %v214_v14  ;;  %249 = vmatpush1.bf16.msra.mxu1 %v214_v14  ;;  %v228_v33 = vpack.c.bf16 %v68_v31, %v66_v30  ;;  %v67_v35 = vld [vmem:[#allocation5 + $0xb0] sm:$0xff]  ;;  %v70_v36 = vld [vmem:[#allocation5 + $0xc8] sm:$0xff]  ;;  %v72_v37 = vld [vmem:[#allocation5 + $0xd8] sm:$0xff] }
  0x30   :  { %217 = vmatprep.subr.bf16.mxu0 %v216_v15  ;;  %242 = vmatprep.subr.bf16.mxu1 %v216_v15  ;;  %v230_v38 = vpack.c.bf16 %v67_v35, %v65_v34  ;;  %v232_v39 = vpack.c.bf16 %v72_v37, %v70_v36  ;;  %v69_v40 = vld [vmem:[#allocation5 + $0xc0] sm:$0xff]  ;;  %v71_v41 = vld [vmem:[#allocation5 + $0xd0] sm:$0xff]  ;;  %v74_v42 = vld [vmem:[#allocation5 + $0xe8] sm:$0xff] }
  0x31   :  { %v76_v43 = vld [vmem:[#allocation5 + $0xf8] sm:$0xff]  ;;  %v234_v44 = vpack.c.bf16 %v71_v41, %v69_v40  ;;  %v73_v46 = vld [vmem:[#allocation5 + $0xe0] sm:$0xff]  ;;  %v75_v47 = vld [vmem:[#allocation5 + $0xf0] sm:$0xff] }
  0x32   :  { %v236_v45 = vpack.c.bf16 %v76_v43, %v74_v42  ;;  %v238_v48 = vpack.c.bf16 %v75_v47, %v73_v46  ;;  %v43_v49 = vld [vmem:[#allocation2] sm:$0xff]  ;;  %v44_v50 = vld [vmem:[#allocation2 + $0x8] sm:$0xff] }
  0x33   :  { %219 = vmatpush1.bf16.msra.mxu0 %v218_v20  ;;  %250 = vmatpush1.bf16.msra.mxu1 %v218_v20  ;;  %v77_v54 = vld [vmem:[%s423_s2] sm:$0x3]  ;;  %s355_s2 = smov [#allocation7]  }
  0x34   :  { %221 = vmatprep.subr.bf16.mxu0 %v220_v21  ;;  %243 = vmatprep.subr.bf16.mxu1 %v220_v21  ;;  %v86_v55 = vrot.slane %v77_v54, %v85_v53  ;;  %v82_v1 = vrot.slane %v77_v54, %v81_v62  ;;  %s193_s13 = sshll.u32 %s355_s2, 4  ;;  %s194_s13 = int_to_ptr.vmem [resolvable:$true] %s193_s13 }
  0x35   :  { %s320_s14 = scalar_lea.vmem %s194_s13, 256  ;;  %p325_p3 = scmp.lt.s32.totalorder %s194_s13, %s194_s13 }
  0x36   :  { %p321_p2 = scmp.ne.s32.totalorder %s194_s13, %s320_s14  ;;  %p326_p4 = scmp.lt.s32.totalorder %s320_s14, %s320_s14 }
  0x37   :  { %223 = vmatpush1.bf16.msra.mxu0 %v222_v26  ;;  %251 = vmatpush1.bf16.msra.mxu1 %v222_v26 }
  0x38   :  { %225 = vmatprep.subr.bf16.mxu0 %v224_v27  ;;  %244 = vmatprep.subr.bf16.mxu1 %v224_v27  ;;  %p327_p5 = por %p326_p4, %p325_p3 }
  0x3a   :  { %p328_p6 = pnand %p327_p5, %p321_p2 }
  0x3b   :  { %227 = vmatpush1.bf16.msra.mxu0 %v226_v32  ;;  %252 = vmatpush1.bf16.msra.mxu1 %v226_v32 }
  0x3c   :  { %229 = vmatprep.subr.bf16.mxu0 %v228_v33  ;;  %245 = vmatprep.subr.bf16.mxu1 %v228_v33 }
  0x3f   :  { %231 = vmatpush1.bf16.msra.mxu0 %v230_v38  ;;  %253 = vmatpush1.bf16.msra.mxu1 %v230_v38 }
  0x40   :  { %233 = vmatprep.subr.bf16.mxu0 %v232_v39  ;;  %246 = vmatprep.subr.bf16.mxu1 %v232_v39 }
  0x43   :  { %235 = vmatpush1.bf16.msra.mxu0 %v234_v44  ;;  %254 = vmatpush1.bf16.msra.mxu1 %v234_v44 }
  0x44   :  { %237 = vmatprep.subr.bf16.mxu0 %v236_v45  ;;  %247 = vmatprep.subr.bf16.mxu1 %v236_v45 }
  0x47   :  { %239 = vmatpush1.bf16.msra.mxu0 %v238_v48  ;;  %255 = vmatpush1.bf16.msra.mxu1 %v238_v48 }
  0x4a   :  { %154 = vmatmul.mubr.f32.vlgmr.msra.gmra.mrb[0].mxu0 %v43_v49  ;;  %160 = vmatmul.mubr.f32.vlgmr.msra.gmra.mrb[0].mxu1 %v44_v50 }
 0x11d   :  { %v155_v56 = vpop.f32.mrb[0].mxu0  ;;  %v161_v57 = vpop.f32.mrb[0].mxu1 }
 0x11e   :  { %v157_v58 = vpop.f32.mrb[1].mxu0  ;;  %v163_v59 = vpop.f32.mrb[1].mxu1  ;;  %v156_v2 = vadd.f32 %v155_v56, %v82_v1  ;;  %v162_v3 = vadd.f32 %v161_v57, %v82_v1 }
 0x11f   :  { %v158_v60 = vadd.f32 %v157_v58, %v86_v55  ;;  %v164_v61 = vadd.f32 %v163_v59, %v86_v55 }
 0x121   :  { %v206_v63 = vmul.f32 -1.442695, %v158_v60  ;;  %v207_v0 = vmul.f32 -1.442695, %v164_v61 }
 0x123   :  { %264 = vpow2.f32 %v206_v63 }
 0x124   :  { %266 = vpow2.f32 %v207_v0 }
 0x125   :  { %268 = vtanh.f32 %v156_v2 }
 0x126   :  { %270 = vtanh.f32 %v162_v3 }
 0x12d   :  { %v265_v4 = vpop.eup %264 }
 0x12e   :  { %v267_v5 = vpop.eup %266  ;;  %v174_v6 = vadd.f32 1.0, %v265_v4 }
 0x12f   :  { %v175_v7 = vadd.f32 1.0, %v267_v5  ;;  %v269_v8 = vpop.eup %268 }
 0x130   :  { %272 = vrcp.f32 %v174_v6  ;;  %v271_v9 = vpop.eup %270  ;;  %v180_v10 = vsub.f32 %v269_v8, %v43_v49 }
 0x131   :  { %274 = vrcp.f32 %v175_v7  ;;  %v181_v12 = vsub.f32 %v271_v9, %v44_v50 }
 0x13a   :  { %v273_v11 = vpop.eup %272 }
 0x13b   :  { %v275_v13 = vpop.eup %274  ;;  %v182_v14 = vmul.f32 %v273_v11, %v180_v10 }
 0x13c   :  { %v183_v15 = vmul.f32 %v275_v13, %v181_v12 }
 0x13d   :  { %v184_v16 = vadd.f32 %v182_v14, %v43_v49 }
 0x13e   :  { %v185_v17 = vadd.f32 %v183_v15, %v44_v50 }
 0x13f   :  { %186 = vst [vmem:[#allocation7] sm:$0xff] %v184_v16 }
 0x140   :  { %187 = vst [vmem:[#allocation7 + $0x8] sm:$0xff] %v185_v17 }
 0x141   :  { %331 = shalt.err (!%p328_p6)
}
 0x142   :  { %s332_s17 = scalar_lea.hbm %s424_s3, 256 }
 0x143   :  { %p333_p7 = scmp.ne.s32.totalorder %s424_s3, %s332_s17  ;;  %p336_p8 = scmp.lt.u32.totalorder %s332_s17, %s424_s3 }
 0x145   :  { %p338_p9 = pnand %p336_p8, %p333_p7 }
 0x147   :  { %341 = shalt.err (!%p338_p9)
}
 0x148   :  { %199 = dma.vmem_to_hbm [thread:$0]  %s194_s13, 256, %s424_s3, [#allocation4], %s349_s22, %s349_s22, %s350_s23  }
 0x149   :  { %346 = dma.done.wait [#allocation4], 256  }
 0x14a   :  { %347 = vsyncadd [#allocation4], 4294967040 }
 0x14b   :  { %203 = vsyncpa [#allocation3], 1 }
 0x14c   :  { %204 = vsyncpa [#allocation6], 1 }
 0x14d   :  { %205 = vsyncpa [#allocation4], 1 }

// kernel: tpu_custom_call.1
= control target key start
LH: loop header
LB: loop body
LE: loop exit
PB: predicated region body
PF: predicated region fallthrough
CT: control target
= control target key end

     0   :  { %8 = vsyncpa [#allocation3], 0  ;;  %s421_s0 = inlined_call_operand.hbm [shape: f32[16,128], index: 0, kind: input, shape index: {}]   ;;  %s422_s1 = inlined_call_operand.hbm [shape: f32[128,256], index: 1, kind: input, shape index: {}]   ;;  %s423_s2 = inlined_call_operand.vmem [shape: f32[1,256], index: 2, kind: input, shape index: {}]   ;;  %s424_s3 = inlined_call_operand.hbm [shape: f32[16,128], index: 3, kind: output, shape index: {}]  }
   0x1   :  { %9 = vsyncpa [#allocation6], 0 }
   0x2   :  { %10 = vsyncpa [#allocation4], 0  ;;  %s348_s12 = smov [#allocation2]   ;;  %s276_s16 = scalar_lea.hbm %s421_s0, 256 }
   0x3   :  { %s16_s13 = sshll.u32 %s348_s12, 4  ;;  %p277_p0 = scmp.ne.s32.totalorder %s421_s0, %s276_s16  ;;  %s17_s13 = int_to_ptr.vmem [resolvable:$true] %s16_s13 }
   0x4   :  { %p280_p1 = scmp.lt.u32.totalorder %s276_s16, %s421_s0 }
   0x6   :  { %p282_p2 = pnand %p280_p1, %p277_p0 }
   0x8   :  { %285 = shalt.err (!%p282_p2)
}
   0x9   :  { %s286_s21 = scalar_lea.vmem %s17_s13, 256  ;;  %p291_p4 = scmp.lt.s32.totalorder %s17_s13, %s17_s13 }
   0xa   :  { %p287_p3 = scmp.ne.s32.totalorder %s17_s13, %s286_s21  ;;  %p292_p5 = scmp.lt.s32.totalorder %s286_s21, %s286_s21 }
   0xc   :  { %p293_p6 = por %p292_p5, %p291_p4 }
   0xe   :  { %p294_p7 = pnand %p293_p6, %p287_p3 }
  0x10   :  { %297 = shalt.err (!%p294_p7)
}
  0x11   :  { %s349_s22 = smov 128   ;;  %s350_s23 = smov 8  }
  0x12   :  { %22 = dma.hbm_to_vmem [thread:$0]  %s421_s0, 256, %s17_s13, [#allocation3], %s349_s22, %s349_s22, %s350_s23  }
  0x13   :  { %s351_s26 = smov [#allocation5]   ;;  %s298_s30 = scalar_lea.hbm %s422_s1, 4096 }
  0x14   :  { %s28_s27 = sshll.u32 %s351_s26, 4  ;;  %p299_p8 = scmp.ne.s32.totalorder %s422_s1, %s298_s30  ;;  %s29_s27 = int_to_ptr.vmem [resolvable:$true] %s28_s27 }
  0x15   :  { %p302_p9 = scmp.lt.u32.totalorder %s298_s30, %s422_s1 }
  0x17   :  { %p304_p10 = pnand %p302_p9, %p299_p8 }
  0x19   :  { %307 = shalt.err (!%p304_p10)
}
  0x1a   :  { %s308_s8 = scalar_lea.vmem %s29_s27, 4096  ;;  %p313_p12 = scmp.lt.s32.totalorder %s29_s27, %s29_s27 }
  0x1b   :  { %p309_p11 = scmp.ne.s32.totalorder %s29_s27, %s308_s8  ;;  %p314_p13 = scmp.lt.s32.totalorder %s308_s8, %s308_s8 }
  0x1d   :  { %p315_p0 = por %p314_p13, %p313_p12 }
  0x1f   :  { %p316_p1 = pnand %p315_p0, %p309_p11 }
  0x21   :  { %319 = shalt.err (!%p316_p1)
}
  0x22   :  { %s352_s0 = smov 256   ;;  %s353_s9 = smov 16  }
  0x23   :  { %34 = dma.hbm_to_vmem [thread:$0]  %s422_s1, 4096, %s29_s27, [#allocation6], %s352_s0, %s352_s0, %s353_s9  }
  0x24   :  { %342 = dma.done.wait [#allocation3], 256  }
  0x25   :  { %343 = vsyncadd [#allocation3], 4294967040 }
  0x26   :  { %344 = dma.done.wait [#allocation6], 4096  }
  0x27   :  { %345 = vsyncadd [#allocation6], 4294963200  ;;  %v354_v0 = vmov 0.0   ;;  %v46_v1 = vld [vmem:[#allocation5 + $0x8] sm:$0xff]  ;;  %v48_v2 = vld [vmem:[#allocation5 + $0x18] sm:$0xff]  ;;  %v79_v51 = vlaneseq }
  0x28   :  { %153 = vmatprep.mubr.f32.mxu0 %v354_v0  ;;  %159 = vmatprep.mubr.f32.mxu1 %v354_v0  ;;  %v45_v3 = vld [vmem:[#allocation5] sm:$0xff]  ;;  %v208_v4 = vpack.c.bf16 %v48_v2, %v46_v1  ;;  %v47_v5 = vld [vmem:[#allocation5 + $0x10] sm:$0xff]  ;;  %v50_v6 = vld [vmem:[#allocation5 + $0x28] sm:$0xff] }
  0x29   :  { %v52_v7 = vld [vmem:[#allocation5 + $0x38] sm:$0xff]  ;;  %v210_v8 = vpack.c.bf16 %v47_v5, %v45_v3  ;;  %v49_v10 = vld [vmem:[#allocation5 + $0x20] sm:$0xff]  ;;  %v51_v11 = vld [vmem:[#allocation5 + $0x30] sm:$0xff]  ;;  %v80_v52 = vshrl.u32 %v79_v51, 7 }
  0x2a   :  { %v212_v9 = vpack.c.bf16 %v52_v7, %v50_v6  ;;  %v54_v12 = vld [vmem:[#allocation5 + $0x48] sm:$0xff]  ;;  %209 = vmatprep.subr.bf16.mxu0 %v208_v4  ;;  %240 = vmatprep.subr.bf16.mxu1 %v208_v4  ;;  %v56_v13 = vld [vmem:[#allocation5 + $0x58] sm:$0xff]  ;;  %v214_v14 = vpack.c.bf16 %v51_v11, %v49_v10  ;;  %v53_v16 = vld [vmem:[#allocation5 + $0x40] sm:$0xff] }
  0x2b   :  { %211 = vmatpush1.bf16.msra.mxu0 %v210_v8  ;;  %248 = vmatpush1.bf16.msra.mxu1 %v210_v8  ;;  %v216_v15 = vpack.c.bf16 %v56_v13, %v54_v12  ;;  %v55_v17 = vld [vmem:[#allocation5 + $0x50] sm:$0xff]  ;;  %v58_v18 = vld [vmem:[#allocation5 + $0x68] sm:$0xff]  ;;  %v60_v19 = vld [vmem:[#allocation5 + $0x78] sm:$0xff]  ;;  %v85_v53 = vsub.s32 1, %v80_v52  ;;  %v81_v62 = vsub.s32 0, %v80_v52 }
  0x2c   :  { %213 = vmatprep.subr.bf16.mxu0 %v212_v9  ;;  %241 = vmatprep.subr.bf16.mxu1 %v212_v9  ;;  %v218_v20 = vpack.c.bf16 %v55_v17, %v53_v16  ;;  %v220_v21 = vpack.c.bf16 %v60_v19, %v58_v18  ;;  %v57_v22 = vld [vmem:[#allocation5 + $0x60] sm:$0xff]  ;;  %v59_v23 = vld [vmem:[#allocation5 + $0x70] sm:$0xff]  ;;  %v62_v24 = vld [vmem:[#allocation5 + $0x88] sm:$0xff] }
  0x2d   :  { %v64_v25 = vld [vmem:[#allocation5 + $0x98] sm:$0xff]  ;;  %v222_v26 = vpack.c.bf16 %v59_v23, %v57_v22  ;;  %v61_v28 = vld [vmem:[#allocation5 + $0x80] sm:$0xff]  ;;  %v63_v29 = vld [vmem:[#allocation5 + $0x90] sm:$0xff] }
  0x2e   :  { %v224_v27 = vpack.c.bf16 %v64_v25, %v62_v24  ;;  %v66_v30 = vld [vmem:[#allocation5 + $0xa8] sm:$0xff]  ;;  %v68_v31 = vld [vmem:[#allocation5 + $0xb8] sm:$0xff]  ;;  %v226_v32 = vpack.c.bf16 %v63_v29, %v61_v28  ;;  %v65_v34 = vld [vmem:[#allocation5 + $0xa0] sm:$0xff] }
  0x2f   :  { %215 = vmatpush1.bf16.msra.mxu0 %v214_v14  ;;  %249 = vmatpush1.bf16.msra.mxu1 %v214_v14  ;;  %v228_v33 = vpack.c.bf16 %v68_v31, %v66_v30  ;;  %v67_v35 = vld [vmem:[#allocation5 + $0xb0] sm:$0xff]  ;;  %v70_v36 = vld [vmem:[#allocation5 + $0xc8] sm:$0xff]  ;;  %v72_v37 = vld [vmem:[#allocation5 + $0xd8] sm:$0xff] }
  0x30   :  { %217 = vmatprep.subr.bf16.mxu0 %v216_v15  ;;  %242 = vmatprep.subr.bf16.mxu1 %v216_v15  ;;  %v230_v38 = vpack.c.bf16 %v67_v35, %v65_v34  ;;  %v232_v39 = vpack.c.bf16 %v72_v37, %v70_v36  ;;  %v69_v40 = vld [vmem:[#allocation5 + $0xc0] sm:$0xff]  ;;  %v71_v41 = vld [vmem:[#allocation5 + $0xd0] sm:$0xff]  ;;  %v74_v42 = vld [vmem:[#allocation5 + $0xe8] sm:$0xff] }
  0x31   :  { %v76_v43 = vld [vmem:[#allocation5 + $0xf8] sm:$0xff]  ;;  %v234_v44 = vpack.c.bf16 %v71_v41, %v69_v40  ;;  %v73_v46 = vld [vmem:[#allocation5 + $0xe0] sm:$0xff]  ;;  %v75_v47 = vld [vmem:[#allocation5 + $0xf0] sm:$0xff] }
  0x32   :  { %v236_v45 = vpack.c.bf16 %v76_v43, %v74_v42  ;;  %v238_v48 = vpack.c.bf16 %v75_v47, %v73_v46  ;;  %v43_v49 = vld [vmem:[#allocation2] sm:$0xff]  ;;  %v44_v50 = vld [vmem:[#allocation2 + $0x8] sm:$0xff] }
  0x33   :  { %219 = vmatpush1.bf16.msra.mxu0 %v218_v20  ;;  %250 = vmatpush1.bf16.msra.mxu1 %v218_v20  ;;  %v77_v54 = vld [vmem:[%s423_s2] sm:$0x3]  ;;  %s355_s2 = smov [#allocation7]  }
  0x34   :  { %221 = vmatprep.subr.bf16.mxu0 %v220_v21  ;;  %243 = vmatprep.subr.bf16.mxu1 %v220_v21  ;;  %v86_v55 = vrot.slane %v77_v54, %v85_v53  ;;  %v82_v1 = vrot.slane %v77_v54, %v81_v62  ;;  %s193_s13 = sshll.u32 %s355_s2, 4  ;;  %s194_s13 = int_to_ptr.vmem [resolvable:$true] %s193_s13 }
  0x35   :  { %s320_s14 = scalar_lea.vmem %s194_s13, 256  ;;  %p325_p3 = scmp.lt.s32.totalorder %s194_s13, %s194_s13 }
  0x36   :  { %p321_p2 = scmp.ne.s32.totalorder %s194_s13, %s320_s14  ;;  %p326_p4 = scmp.lt.s32.totalorder %s320_s14, %s320_s14 }
  0x37   :  { %223 = vmatpush1.bf16.msra.mxu0 %v222_v26  ;;  %251 = vmatpush1.bf16.msra.mxu1 %v222_v26 }
  0x38   :  { %225 = vmatprep.subr.bf16.mxu0 %v224_v27  ;;  %244 = vmatprep.subr.bf16.mxu1 %v224_v27  ;;  %p327_p5 = por %p326_p4, %p325_p3 }
  0x3a   :  { %p328_p6 = pnand %p327_p5, %p321_p2 }
  0x3b   :  { %227 = vmatpush1.bf16.msra.mxu0 %v226_v32  ;;  %252 = vmatpush1.bf16.msra.mxu1 %v226_v32 }
  0x3c   :  { %229 = vmatprep.subr.bf16.mxu0 %v228_v33  ;;  %245 = vmatprep.subr.bf16.mxu1 %v228_v33 }
  0x3f   :  { %231 = vmatpush1.bf16.msra.mxu0 %v230_v38  ;;  %253 = vmatpush1.bf16.msra.mxu1 %v230_v38 }
  0x40   :  { %233 = vmatprep.subr.bf16.mxu0 %v232_v39  ;;  %246 = vmatprep.subr.bf16.mxu1 %v232_v39 }
  0x43   :  { %235 = vmatpush1.bf16.msra.mxu0 %v234_v44  ;;  %254 = vmatpush1.bf16.msra.mxu1 %v234_v44 }
  0x44   :  { %237 = vmatprep.subr.bf16.mxu0 %v236_v45  ;;  %247 = vmatprep.subr.bf16.mxu1 %v236_v45 }
  0x47   :  { %239 = vmatpush1.bf16.msra.mxu0 %v238_v48  ;;  %255 = vmatpush1.bf16.msra.mxu1 %v238_v48 }
  0x4a   :  { %154 = vmatmul.mubr.f32.vlgmr.msra.gmra.mrb[0].mxu0 %v43_v49  ;;  %160 = vmatmul.mubr.f32.vlgmr.msra.gmra.mrb[0].mxu1 %v44_v50 }
 0x11d   :  { %v155_v56 = vpop.f32.mrb[0].mxu0  ;;  %v161_v57 = vpop.f32.mrb[0].mxu1 }
 0x11e   :  { %v157_v58 = vpop.f32.mrb[1].mxu0  ;;  %v163_v59 = vpop.f32.mrb[1].mxu1  ;;  %v156_v2 = vadd.f32 %v155_v56, %v82_v1  ;;  %v162_v3 = vadd.f32 %v161_v57, %v82_v1 }
 0x11f   :  { %v158_v60 = vadd.f32 %v157_v58, %v86_v55  ;;  %v164_v61 = vadd.f32 %v163_v59, %v86_v55 }
 0x121   :  { %v206_v63 = vmul.f32 -1.442695, %v158_v60  ;;  %v207_v0 = vmul.f32 -1.442695, %v164_v61 }
 0x123   :  { %264 = vpow2.f32 %v206_v63 }
 0x124   :  { %266 = vpow2.f32 %v207_v0 }
 0x125   :  { %268 = vtanh.f32 %v156_v2 }
 0x126   :  { %270 = vtanh.f32 %v162_v3 }
 0x12d   :  { %v265_v4 = vpop.eup %264 }
 0x12e   :  { %v267_v5 = vpop.eup %266  ;;  %v174_v6 = vadd.f32 1.0, %v265_v4 }
 0x12f   :  { %v175_v7 = vadd.f32 1.0, %v267_v5  ;;  %v269_v8 = vpop.eup %268 }
 0x130   :  { %272 = vrcp.f32 %v174_v6  ;;  %v271_v9 = vpop.eup %270  ;;  %v180_v10 = vsub.f32 %v269_v8, %v43_v49 }
 0x131   :  { %274 = vrcp.f32 %v175_v7  ;;  %v181_v12 = vsub.f32 %v271_v9, %v44_v50 }
 0x13a   :  { %v273_v11 = vpop.eup %272 }
 0x13b   :  { %v275_v13 = vpop.eup %274  ;;  %v182_v14 = vmul.f32 %v273_v11, %v180_v10 }
 0x13c   :  { %v183_v15 = vmul.f32 %v275_v13, %v181_v12 }
 0x13d   :  { %v184_v16 = vadd.f32 %v182_v14, %v43_v49 }
 0x13e   :  { %v185_v17 = vadd.f32 %v183_v15, %v44_v50 }
 0x13f   :  { %186 = vst [vmem:[#allocation7] sm:$0xff] %v184_v16 }
 0x140   :  { %187 = vst [vmem:[#allocation7 + $0x8] sm:$0xff] %v185_v17 }
 0x141   :  { %331 = shalt.err (!%p328_p6)
}
 0x142   :  { %s332_s17 = scalar_lea.hbm %s424_s3, 256 }
 0x143   :  { %p333_p7 = scmp.ne.s32.totalorder %s424_s3, %s332_s17  ;;  %p336_p8 = scmp.lt.u32.totalorder %s332_s17, %s424_s3 }
 0x145   :  { %p338_p9 = pnand %p336_p8, %p333_p7 }
 0x147   :  { %341 = shalt.err (!%p338_p9)
}
 0x148   :  { %199 = dma.vmem_to_hbm [thread:$0]  %s194_s13, 256, %s424_s3, [#allocation4], %s349_s22, %s349_s22, %s350_s23  }
 0x149   :  { %346 = dma.done.wait [#allocation4], 256  }
 0x14a   :  { %347 = vsyncadd [#allocation4], 4294967040 }
 0x14b   :  { %203 = vsyncpa [#allocation3], 1 }
 0x14c   :  { %204 = vsyncpa [#allocation6], 1 }
 0x14d   :  { %205 = vsyncpa [#allocation4], 1 }

</bundles_post_ra>
